<compile_context>
chip_gen: v6e
topology: v6e:2x2x1
jax: 0.10.0
libtpu: 0.0.40
codegen_flags: <defaults>
</compile_context>

<pallas_src>
import jax
import jax.numpy as jnp
from jax.experimental import pallas as pl
from jax.experimental.pallas import tpu as pltpu

VIEWS = ('L-CC', 'L-MLO', 'R-CC', 'R-MLO')


def _make_pad_kernel(pad, n_views, sizes):
    """sizes[i] = (H, W, Ho, Wo) for view i."""
    p_left, p_right, p_top, p_bot = pad

    def pad_kernel(*refs):
        x_refs, o_refs = refs[:n_views], refs[n_views:]
        for (H, W, Ho, Wo), x_ref, o_ref in zip(sizes, x_refs, o_refs):
            TB = o_ref.shape[0]
            dt = o_ref.dtype
            x = x_ref[...]  # (TB, H, W)

            # Build the padded middle rows in vregs and issue ONE full-width,
            # lane-dense store (no 1-2 lane masked stores, no lane-offset
            # interior store).
            parts = []
            if p_left:
                parts.append(jnp.zeros((TB, H, p_left), dt))
            parts.append(x.astype(dt))
            if p_right:
                parts.append(jnp.zeros((TB, H, p_right), dt))
            mid = parts[0] if len(parts) == 1 else jnp.concatenate(parts, axis=-1)
            o_ref[:, p_top:p_top + H, :] = mid

            # Top / bottom zero strips: full-width stores, disjoint from the
            # middle rows, so every output element is written exactly once.
            if p_top:
                o_ref[:, 0:p_top, :] = jnp.zeros((TB, p_top, Wo), dt)
            if p_bot:
                o_ref[:, p_top + H:Ho, :] = jnp.zeros((TB, p_bot, Wo), dt)

    return pad_kernel


def _choose_tb(B, per_slice_bytes, target_bytes):
    """Largest divisor of B with per-step bytes <= target; keep grid >= 2."""
    best = 1
    upper = B // 2 if B >= 2 else B  # grid length >= 2 so v7x's 2 TCs both work
    upper = max(upper, 1)
    for d in range(1, upper + 1):
        if B % d == 0 and d * per_slice_bytes <= target_bytes:
            best = d
    return best


def all_views_pad(x_dict, pad):
    """Pallas equivalent of AllViewsPad.forward: pad all 4 views in one kernel."""
    assert len(pad) == 4, "only spatial (H, W) padding supported"
    pad = tuple(int(p) for p in pad)  # pads must be static Python ints
    assert min(pad) >= 0, "negative (cropping) pads not supported"
    p_left, p_right, p_top, p_bot = pad

    xs = [x_dict[v] for v in VIEWS]
    N, C = xs[0].shape[:2]
    for x in xs:
        assert x.shape[:2] == (N, C), "all views must share batch/channel dims"
    B = N * C

    # Flatten (N, C) -> one long grid axis; this is a free reshape (no copy).
    in_flat = [x.reshape(B, x.shape[2], x.shape[3]) for x in xs]

    # Per-generation VMEM budget.
    try:
        vmem_cap = int(pltpu.get_tpu_info().vmem_capacity_bytes)
    except Exception:
        vmem_cap = 64 << 20  # conservative fallback (v7x-sized)
    per_step_target = min(16 << 20, vmem_cap // 6)

    # Bytes moved per flattened (N*C) slice summed over all 4 views (in + out).
    sizes = []
    per_slice_bytes = 0
    total_bytes = 0
    for x in in_flat:
        H, W = x.shape[1], x.shape[2]
        Ho, Wo = H + p_top + p_bot, W + p_left + p_right
        sizes.append((H, W, Ho, Wo))
        per_slice_bytes += (H * W + Ho * Wo) * x.dtype.itemsize
        total_bytes += B * (H * W + Ho * Wo) * x.dtype.itemsize

    TB = _choose_tb(B, per_slice_bytes, per_step_target)
    grid = (B // TB,)

    out_shapes, in_specs, out_specs = [], [], []
    for x, (H, W, Ho, Wo) in zip(in_flat, sizes):
        out_shapes.append(jax.ShapeDtypeStruct((B, Ho, Wo), x.dtype))
        in_specs.append(pl.BlockSpec((TB, H, W), lambda b: (b, 0, 0)))
        out_specs.append(pl.BlockSpec((TB, Ho, Wo), lambda b: (b, 0, 0)))

    # Double-buffered (4 in + 4 out) blocks + headroom; keep below ~3/4 of the
    # physical VMEM of whatever generation we are on (96 MiB on v5e/v6e,
    # 48 MiB on v7x), and lift v5e's 16 MiB scoped default.
    need = 2 * TB * per_slice_bytes + (2 << 20)
    vmem_limit = int(min(max(need, 32 << 20), vmem_cap * 3 // 4))

    outs = pl.pallas_call(
        _make_pad_kernel(pad, len(in_flat), sizes),
        out_shape=tuple(out_shapes),
        grid=grid,
        in_specs=in_specs,
        out_specs=tuple(out_specs),
        compiler_params=pltpu.CompilerParams(
            dimension_semantics=("parallel",),
            vmem_limit_bytes=vmem_limit,
        ),
        cost_estimate=pl.CostEstimate(
            flops=0, transcendentals=0, bytes_accessed=total_bytes),
    )(*in_flat)

    result = {}
    for v, x, o, (H, W, Ho, Wo) in zip(VIEWS, xs, outs, sizes):
        result[v] = o.reshape(N, C, Ho, Wo)
    return result


if __name__ == "__main__":
    key = jax.random.PRNGKey(0)
    keys = jax.random.split(key, len(VIEWS))

    # small deterministic inputs: each view is NCHW = (2, 4, 16, 16)
    x = {v: jax.random.normal(k, (2, 4, 16, 16), dtype=jnp.float32)
         for v, k in zip(VIEWS, keys)}
    pad = (1, 2, 3, 4)  # (left, right, top, bottom) -> out spatial (23, 19)

    out = all_views_pad(x, pad)
    out = jax.tree_util.tree_map(jax.block_until_ready, out)

    # verify against the plain-JAX reference of F.pad semantics
    ok = True
    for v in VIEWS:
        ref = jnp.pad(x[v], ((0, 0), (0, 0), (pad[2], pad[3]), (pad[0], pad[1])))
        ok &= out[v].shape == ref.shape
        ok &= bool(jnp.allclose(out[v], ref))
    assert ok, "mismatch vs reference"

    print("KERNEL_OK")
</pallas_src>

<mosaic_0001>
module attributes {stable_mosaic.version = 11 : i64} {
  func.func @pad_kernel(%arg0: i32, %arg1: memref<4x16x16xf32, #tpu.memory_space<vmem>>, %arg2: memref<4x16x16xf32, #tpu.memory_space<vmem>>, %arg3: memref<4x16x16xf32, #tpu.memory_space<vmem>>, %arg4: memref<4x16x16xf32, #tpu.memory_space<vmem>>, %arg5: memref<4x23x19xf32, #tpu.memory_space<vmem>>, %arg6: memref<4x23x19xf32, #tpu.memory_space<vmem>>, %arg7: memref<4x23x19xf32, #tpu.memory_space<vmem>>, %arg8: memref<4x23x19xf32, #tpu.memory_space<vmem>>) attributes {dimension_semantics = [#tpu.dimension_semantics<parallel>], iteration_bounds = array<i64: 2>, scalar_prefetch = 0 : i64, scratch_operands = 0 : i64, tpu.core_type = #tpu.core_type<tc>, window_params = [{transform_indices = @transform_0, window_bounds = array<i64: 4, 16, 16>}, {transform_indices = @transform_1, window_bounds = array<i64: 4, 16, 16>}, {transform_indices = @transform_2, window_bounds = array<i64: 4, 16, 16>}, {transform_indices = @transform_3, window_bounds = array<i64: 4, 16, 16>}, {transform_indices = @transform_4, window_bounds = array<i64: 4, 23, 19>}, {transform_indices = @transform_5, window_bounds = array<i64: 4, 23, 19>}, {transform_indices = @transform_6, window_bounds = array<i64: 4, 23, 19>}, {transform_indices = @transform_7, window_bounds = array<i64: 4, 23, 19>}]} {
    %c0 = arith.constant 0 : index
    %c0_0 = arith.constant 0 : index
    %c0_1 = arith.constant 0 : index
    %0 = vector.load %arg1[%c0, %c0_0, %c0_1] : memref<4x16x16xf32, #tpu.memory_space<vmem>>, vector<4x16x16xf32>
    %cst = arith.constant 0.000000e+00 : f32
    %1 = vector.broadcast %cst : f32 to vector<4x16x1xf32>
    %cst_2 = arith.constant 0.000000e+00 : f32
    %2 = vector.broadcast %cst_2 : f32 to vector<4x16x2xf32>
    %3 = tpu.concatenate %1, %0, %2 in 2 : vector<4x16x1xf32>, vector<4x16x16xf32>, vector<4x16x2xf32> -> vector<4x16x19xf32>
    %c0_3 = arith.constant 0 : index
    %c3 = arith.constant 3 : index
    %c0_4 = arith.constant 0 : index
    %4 = vector.load %arg5[%c0_3, %c3, %c0_4] : memref<4x23x19xf32, #tpu.memory_space<vmem>>, vector<4x16x19xf32>
    tpu.vector_store %arg5[%c0_3, %c3, %c0_4], %3 {strides = array<i32>} : memref<4x23x19xf32, #tpu.memory_space<vmem>>, vector<4x16x19xf32>,
    %cst_5 = arith.constant 0.000000e+00 : f32
    %5 = vector.broadcast %cst_5 : f32 to vector<4x3x19xf32>
    %c0_6 = arith.constant 0 : index
    %c0_7 = arith.constant 0 : index
    %c0_8 = arith.constant 0 : index
    %6 = vector.load %arg5[%c0_6, %c0_7, %c0_8] : memref<4x23x19xf32, #tpu.memory_space<vmem>>, vector<4x3x19xf32>
    tpu.vector_store %arg5[%c0_6, %c0_7, %c0_8], %5 {strides = array<i32>} : memref<4x23x19xf32, #tpu.memory_space<vmem>>, vector<4x3x19xf32>,
    %cst_9 = arith.constant 0.000000e+00 : f32
    %7 = vector.broadcast %cst_9 : f32 to vector<4x4x19xf32>
    %c0_10 = arith.constant 0 : index
    %c19 = arith.constant 19 : index
    %c0_11 = arith.constant 0 : index
    %8 = vector.load %arg5[%c0_10, %c19, %c0_11] : memref<4x23x19xf32, #tpu.memory_space<vmem>>, vector<4x4x19xf32>
    tpu.vector_store %arg5[%c0_10, %c19, %c0_11], %7 {strides = array<i32>} : memref<4x23x19xf32, #tpu.memory_space<vmem>>, vector<4x4x19xf32>,
    %c0_12 = arith.constant 0 : index
    %c0_13 = arith.constant 0 : index
    %c0_14 = arith.constant 0 : index
    %9 = vector.load %arg2[%c0_12, %c0_13, %c0_14] : memref<4x16x16xf32, #tpu.memory_space<vmem>>, vector<4x16x16xf32>
    %cst_15 = arith.constant 0.000000e+00 : f32
    %10 = vector.broadcast %cst_15 : f32 to vector<4x16x1xf32>
    %cst_16 = arith.constant 0.000000e+00 : f32
    %11 = vector.broadcast %cst_16 : f32 to vector<4x16x2xf32>
    %12 = tpu.concatenate %10, %9, %11 in 2 : vector<4x16x1xf32>, vector<4x16x16xf32>, vector<4x16x2xf32> -> vector<4x16x19xf32>
    %c0_17 = arith.constant 0 : index
    %c3_18 = arith.constant 3 : index
    %c0_19 = arith.constant 0 : index
    %13 = vector.load %arg6[%c0_17, %c3_18, %c0_19] : memref<4x23x19xf32, #tpu.memory_space<vmem>>, vector<4x16x19xf32>
    tpu.vector_store %arg6[%c0_17, %c3_18, %c0_19], %12 {strides = array<i32>} : memref<4x23x19xf32, #tpu.memory_space<vmem>>, vector<4x16x19xf32>,
    %cst_20 = arith.constant 0.000000e+00 : f32
    %14 = vector.broadcast %cst_20 : f32 to vector<4x3x19xf32>
    %c0_21 = arith.constant 0 : index
    %c0_22 = arith.constant 0 : index
    %c0_23 = arith.constant 0 : index
    %15 = vector.load %arg6[%c0_21, %c0_22, %c0_23] : memref<4x23x19xf32, #tpu.memory_space<vmem>>, vector<4x3x19xf32>
    tpu.vector_store %arg6[%c0_21, %c0_22, %c0_23], %14 {strides = array<i32>} : memref<4x23x19xf32, #tpu.memory_space<vmem>>, vector<4x3x19xf32>,
    %cst_24 = arith.constant 0.000000e+00 : f32
    %16 = vector.broadcast %cst_24 : f32 to vector<4x4x19xf32>
    %c0_25 = arith.constant 0 : index
    %c19_26 = arith.constant 19 : index
    %c0_27 = arith.constant 0 : index
    %17 = vector.load %arg6[%c0_25, %c19_26, %c0_27] : memref<4x23x19xf32, #tpu.memory_space<vmem>>, vector<4x4x19xf32>
    tpu.vector_store %arg6[%c0_25, %c19_26, %c0_27], %16 {strides = array<i32>} : memref<4x23x19xf32, #tpu.memory_space<vmem>>, vector<4x4x19xf32>,
    %c0_28 = arith.constant 0 : index
    %c0_29 = arith.constant 0 : index
    %c0_30 = arith.constant 0 : index
    %18 = vector.load %arg3[%c0_28, %c0_29, %c0_30] : memref<4x16x16xf32, #tpu.memory_space<vmem>>, vector<4x16x16xf32>
    %cst_31 = arith.constant 0.000000e+00 : f32
    %19 = vector.broadcast %cst_31 : f32 to vector<4x16x1xf32>
    %cst_32 = arith.constant 0.000000e+00 : f32
    %20 = vector.broadcast %cst_32 : f32 to vector<4x16x2xf32>
    %21 = tpu.concatenate %19, %18, %20 in 2 : vector<4x16x1xf32>, vector<4x16x16xf32>, vector<4x16x2xf32> -> vector<4x16x19xf32>
    %c0_33 = arith.constant 0 : index
    %c3_34 = arith.constant 3 : index
    %c0_35 = arith.constant 0 : index
    %22 = vector.load %arg7[%c0_33, %c3_34, %c0_35] : memref<4x23x19xf32, #tpu.memory_space<vmem>>, vector<4x16x19xf32>
    tpu.vector_store %arg7[%c0_33, %c3_34, %c0_35], %21 {strides = array<i32>} : memref<4x23x19xf32, #tpu.memory_space<vmem>>, vector<4x16x19xf32>,
    %cst_36 = arith.constant 0.000000e+00 : f32
    %23 = vector.broadcast %cst_36 : f32 to vector<4x3x19xf32>
    %c0_37 = arith.constant 0 : index
    %c0_38 = arith.constant 0 : index
    %c0_39 = arith.constant 0 : index
    %24 = vector.load %arg7[%c0_37, %c0_38, %c0_39] : memref<4x23x19xf32, #tpu.memory_space<vmem>>, vector<4x3x19xf32>
    tpu.vector_store %arg7[%c0_37, %c0_38, %c0_39], %23 {strides = array<i32>} : memref<4x23x19xf32, #tpu.memory_space<vmem>>, vector<4x3x19xf32>,
    %cst_40 = arith.constant 0.000000e+00 : f32
    %25 = vector.broadcast %cst_40 : f32 to vector<4x4x19xf32>
    %c0_41 = arith.constant 0 : index
    %c19_42 = arith.constant 19 : index
    %c0_43 = arith.constant 0 : index
    %26 = vector.load %arg7[%c0_41, %c19_42, %c0_43] : memref<4x23x19xf32, #tpu.memory_space<vmem>>, vector<4x4x19xf32>
    tpu.vector_store %arg7[%c0_41, %c19_42, %c0_43], %25 {strides = array<i32>} : memref<4x23x19xf32, #tpu.memory_space<vmem>>, vector<4x4x19xf32>,
    %c0_44 = arith.constant 0 : index
    %c0_45 = arith.constant 0 : index
    %c0_46 = arith.constant 0 : index
    %27 = vector.load %arg4[%c0_44, %c0_45, %c0_46] : memref<4x16x16xf32, #tpu.memory_space<vmem>>, vector<4x16x16xf32>
    %cst_47 = arith.constant 0.000000e+00 : f32
    %28 = vector.broadcast %cst_47 : f32 to vector<4x16x1xf32>
    %cst_48 = arith.constant 0.000000e+00 : f32
    %29 = vector.broadcast %cst_48 : f32 to vector<4x16x2xf32>
    %30 = tpu.concatenate %28, %27, %29 in 2 : vector<4x16x1xf32>, vector<4x16x16xf32>, vector<4x16x2xf32> -> vector<4x16x19xf32>
    %c0_49 = arith.constant 0 : index
    %c3_50 = arith.constant 3 : index
    %c0_51 = arith.constant 0 : index
    %31 = vector.load %arg8[%c0_49, %c3_50, %c0_51] : memref<4x23x19xf32, #tpu.memory_space<vmem>>, vector<4x16x19xf32>
    tpu.vector_store %arg8[%c0_49, %c3_50, %c0_51], %30 {strides = array<i32>} : memref<4x23x19xf32, #tpu.memory_space<vmem>>, vector<4x16x19xf32>,
    %cst_52 = arith.constant 0.000000e+00 : f32
    %32 = vector.broadcast %cst_52 : f32 to vector<4x3x19xf32>
    %c0_53 = arith.constant 0 : index
    %c0_54 = arith.constant 0 : index
    %c0_55 = arith.constant 0 : index
    %33 = vector.load %arg8[%c0_53, %c0_54, %c0_55] : memref<4x23x19xf32, #tpu.memory_space<vmem>>, vector<4x3x19xf32>
    tpu.vector_store %arg8[%c0_53, %c0_54, %c0_55], %32 {strides = array<i32>} : memref<4x23x19xf32, #tpu.memory_space<vmem>>, vector<4x3x19xf32>,
    %cst_56 = arith.constant 0.000000e+00 : f32
    %34 = vector.broadcast %cst_56 : f32 to vector<4x4x19xf32>
    %c0_57 = arith.constant 0 : index
    %c19_58 = arith.constant 19 : index
    %c0_59 = arith.constant 0 : index
    %35 = vector.load %arg8[%c0_57, %c19_58, %c0_59] : memref<4x23x19xf32, #tpu.memory_space<vmem>>, vector<4x4x19xf32>
    tpu.vector_store %arg8[%c0_57, %c19_58, %c0_59], %34 {strides = array<i32>} : memref<4x23x19xf32, #tpu.memory_space<vmem>>, vector<4x4x19xf32>,
    return
  }
  func.func @transform_0(%arg0: i32) -> (i32, i32, i32) {
    %c0_i32 = arith.constant 0 : i32
    %c0_i32_0 = arith.constant 0 : i32
    %c0_i32_1 = arith.constant 0 : i32
    return %arg0, %c0_i32, %c0_i32_0 : i32, i32, i32
  }
  func.func @transform_1(%arg0: i32) -> (i32, i32, i32) {
    %c0_i32 = arith.constant 0 : i32
    %c0_i32_0 = arith.constant 0 : i32
    %c0_i32_1 = arith.constant 0 : i32
    return %arg0, %c0_i32, %c0_i32_0 : i32, i32, i32
  }
  func.func @transform_2(%arg0: i32) -> (i32, i32, i32) {
    %c0_i32 = arith.constant 0 : i32
    %c0_i32_0 = arith.constant 0 : i32
    %c0_i32_1 = arith.constant 0 : i32
    return %arg0, %c0_i32, %c0_i32_0 : i32, i32, i32
  }
  func.func @transform_3(%arg0: i32) -> (i32, i32, i32) {
    %c0_i32 = arith.constant 0 : i32
    %c0_i32_0 = arith.constant 0 : i32
    %c0_i32_1 = arith.constant 0 : i32
    return %arg0, %c0_i32, %c0_i32_0 : i32, i32, i32
  }
  func.func @transform_4(%arg0: i32) -> (i32, i32, i32) {
    %c0_i32 = arith.constant 0 : i32
    %c0_i32_0 = arith.constant 0 : i32
    %c0_i32_1 = arith.constant 0 : i32
    return %arg0, %c0_i32, %c0_i32_0 : i32, i32, i32
  }
  func.func @transform_5(%arg0: i32) -> (i32, i32, i32) {
    %c0_i32 = arith.constant 0 : i32
    %c0_i32_0 = arith.constant 0 : i32
    %c0_i32_1 = arith.constant 0 : i32
    return %arg0, %c0_i32, %c0_i32_0 : i32, i32, i32
  }
  func.func @transform_6(%arg0: i32) -> (i32, i32, i32) {
    %c0_i32 = arith.constant 0 : i32
    %c0_i32_0 = arith.constant 0 : i32
    %c0_i32_1 = arith.constant 0 : i32
    return %arg0, %c0_i32, %c0_i32_0 : i32, i32, i32
  }
  func.func @transform_7(%arg0: i32) -> (i32, i32, i32) {
    %c0_i32 = arith.constant 0 : i32
    %c0_i32_0 = arith.constant 0 : i32
    %c0_i32_1 = arith.constant 0 : i32
    return %arg0, %c0_i32, %c0_i32_0 : i32, i32, i32
  }
}

</mosaic_0001>

<bundles_post_ra>
// kernel: tpu_custom_call.1
= control target key start
LH: loop header
LB: loop body
LE: loop exit
PB: predicated region body
PF: predicated region fallthrough
CT: control target
= control target key end

     0   :  { %s1827_s0 = inlined_call_operand.hbm [shape: f32[8,16,16], index: 0, kind: input, shape index: {}]   ;;  %s1828_s1 = inlined_call_operand.hbm [shape: f32[8,16,16], index: 1, kind: input, shape index: {}]   ;;  %s1829_s2 = inlined_call_operand.hbm [shape: f32[8,16,16], index: 2, kind: input, shape index: {}]   ;;  %s1830_s3 = inlined_call_operand.hbm [shape: f32[8,16,16], index: 3, kind: input, shape index: {}]   ;;  %s1831_s4 = inlined_call_operand.vmem [shape: f32[8,23,19], index: 4, kind: output, shape index: {0}]   ;;  %s1832_s5 = inlined_call_operand.vmem [shape: f32[8,23,19], index: 5, kind: output, shape index: {1}]   ;;  %s1833_s6 = inlined_call_operand.vmem [shape: f32[8,23,19], index: 6, kind: output, shape index: {2}]   ;;  %s1834_s7 = inlined_call_operand.vmem [shape: f32[8,23,19], index: 7, kind: output, shape index: {3}]  }
   0x1   :  { %1841 = sst [smem:[#allocation14_spill]] %s1827_s0 }
   0x2   :  { %1842 = sst [smem:[#allocation15_spill]] %s1828_s1 }
   0x3   :  { %13 = vsyncpa [#allocation3], 0 }
   0x4   :  { %15 = vsyncpa [#allocation3 + $0x1], 0 }
   0x5   :  { %16 = vsyncpa [#allocation5], 0 }
   0x6   :  { %18 = vsyncpa [#allocation5 + $0x1], 0 }
   0x7   :  { %19 = vsyncpa [#allocation8], 0 }
   0x8   :  { %21 = vsyncpa [#allocation8 + $0x1], 0  ;;  %s1315_s24 = smov 0   ;;  %s1317_s25 = smov 0  }
   0x9   :  { %s1319_s26 = smov 0   ;;  %s1321_s27 = smov 0  }
   0xa LB: > { %1843 = sst [smem:[#allocation12_spill]] %s1261_s26  ;;  %s1334_s28 = sadd.s32 4294967295, %s1265_s27   ;;  %s1265_s27 = sphi %s1321_s27, %s1861_s27   ;;  %s1261_s26 = sphi %s1319_s26, %s1858_s26   ;;  %s1257_s25 = sphi %s1317_s25, %s1860_s25   ;;  %s1253_s24 = sphi %s1315_s24, %s1859_s24  }
   0xb   : > { %s1337_s29 = sadd.s32 1, %s1265_s27   ;;  %s34_s8 = sadd.s32 1, %s1261_s26 }
   0xc   : > { %s31_s30 = ssub.s32 %s1265_s27, %s1337_s29  ;;  %p41_p1 = scmp.ne.s32.totalorder %s1261_s26, %s1257_s25 }
   0xd   : > { %p32_p0 = scmp.eq.s32.totalorder %s31_s30, 0  ;;  %p42_p2 = scmp.eq.s32.totalorder %s1265_s27, 0 }
   0xe   : > { %p47_p3 = scmp.ne.s32.totalorder %s1257_s25, %s1253_s24  ;;  %p48_p5 = scmp.eq.s32.totalorder %s1334_s28, 0 }
   0xf   : > { %s1347_s9 = scalar_select %p32_p0, %s1261_s26, %s34_s8  }
  0x10   : > { %p43_p4 = por %p42_p2, %p41_p1  ;;  %p1074_p6 = scmp.lt.s32.totalorder %s1265_s27, 2 }
  0x11   : > { %1844 = sst [smem:[#allocation13_spill]] %s1347_s9  ;;  %p1351_p7 = por %p48_p5, %p47_p3 }
  0x12   : > { %s1356_s11 = sand.u32 1, %s1261_s26   ;;  %s1362_s13 = sshll.u32 %s1265_s27, 10 }
  0x13   : > { %s1845_s10 = scalar_select %p1351_p7, 1, 0 }
  0x14   : > { %s1359_s12 = sshll.u32 %s1356_s11, 6  ;;  %p1364_p8 = pnand %p1074_p6, %p43_p4 }
  0x15   : > { %s275_s15 = sand.u32 1, %s1265_s27   ;;  %s1847_s1 = sld [smem:[#allocation15_spill]] }
  0x16   : > { %s279_s19 = scalar_lea.vmem [#allocation4], %s1359_s12  ;;  %s1380_s21 = scalar_lea.sflag [#allocation5], %s275_s15 }
  0x17   : > { %s287_s20 = sshll.u32 %s279_s19, 4  ;;  %p1386_p12 = pneg %p1364_p8  ;;  %s1377_s20 = int_to_ptr.vmem [resolvable:$true] %s287_s20 }
  0x1b   : > { %s1373_s18 = scalar_lea.hbm %s1847_s1, %s1362_s13  ;;  %s1116_s8 = scalar_lea.hbm %s1847_s1, 2048 }
  0x1c   : > { %s1111_s22 = scalar_lea.hbm %s1373_s18, 1024  ;;  %p1117_p1 = scmp.lt.s32.totalorder %s1373_s18, %s1847_s1 }
  0x1d   : > { %p1112_p11 = scmp.ne.s32.totalorder %s1373_s18, %s1111_s22  ;;  %p1118_p2 = scmp.lt.s32.totalorder %s1116_s8, %s1111_s22 }
  0x1f   : > { %p1114_p13 = pnand %p1386_p12, %p1112_p11  ;;  %p1119_p3 = por %p1118_p2, %p1117_p1 }
  0x21   : > { %p1115_p0 = pneg %p1114_p13 }
  0x23   : > { %p1120_p4 = pnand %p1119_p3, %p1115_p0 }
  0x25   : > { %1123 = shalt.err (!%p1120_p4)
}
  0x26   : > { %s1124_s15 = scalar_lea.vmem %s1377_s20, 1024  ;;  %s1267_s19 = smov [#allocation4]  }
  0x27   : > { %p1125_p5 = scmp.ne.s32.totalorder %s1377_s20, %s1124_s15  ;;  %s1129_s24 = sshll.u32 %s1267_s19, 4  ;;  %s1130_s24 = int_to_ptr.vmem [resolvable:$false] %s1129_s24 }
  0x28   : > { %s1131_s30 = scalar_lea.vmem %s1130_s24, 2048  ;;  %p1132_p13 = scmp.lt.s32.totalorder %s1377_s20, %s1130_s24 }
  0x29   : > { %p1127_p6 = pnand %p1125_p5, %p1386_p12  ;;  %p1133_p9 = scmp.lt.s32.totalorder %s1131_s30, %s1124_s15 }
  0x2b   : > { %p1128_p11 = pneg %p1127_p6  ;;  %p1134_p10 = por %p1133_p9, %p1132_p13 }
  0x2d   : > { %p1135_p7 = pnand %p1134_p10, %p1128_p11 }
  0x2f   : > { %1138 = shalt.err (!%p1135_p7)
}
  0x30   : > { %s1836_s22 = smov 128   ;;  %s1838_s8 = smov 8  }
  0x31   : > { %1067 = dma.hbm_to_vmem [thread:$0]  (!%p1364_p8), %s1373_s18, 1024, %s1377_s20, %s1380_s21, %s1836_s22, %s1836_s22, %s1838_s8  }
  0x32   : > { %p1849_p9 = scmp.lt.s32.totalorder %s1265_s27, 3  ;;  %p1850_p7 = scmp.ge.s32.totalorder %s1265_s27, 1 }
  0x33   : > { %s1852_s0 = sld [smem:[#allocation14_spill]]  ;;  %s257_s24 = scalar_lea.vmem [#allocation2], %s1359_s12 }
  0x34   : > { %p1416_p10 = pnand %p1850_p7, %p1849_p9  ;;  %s265_s30 = sshll.u32 %s257_s24, 4  ;;  %s1427_s30 = int_to_ptr.vmem [resolvable:$true] %s265_s30 }
  0x35   : > { %s1433_s27 = scalar_lea.hbm %s1829_s2, %s1362_s13  ;;  %s254_s20 = scalar_lea.sflag [#allocation3], %s1356_s11 }
  0x36   : > { %s1851_s16 = scalar_select %p1416_p10, 1, 0 }
  0x39   : > { %s1424_s19 = scalar_lea.hbm %s1852_s0, %s1362_s13  ;;  %s1144_s8 = scalar_lea.hbm %s1852_s0, 2048 }
  0x3a   : > { %s1139_s22 = scalar_lea.hbm %s1424_s19, 1024  ;;  %p1145_p3 = scmp.lt.s32.totalorder %s1424_s19, %s1852_s0 }
  0x3b   : > { %p1140_p0 = scmp.ne.s32.totalorder %s1424_s19, %s1139_s22  ;;  %p1146_p4 = scmp.lt.s32.totalorder %s1144_s8, %s1139_s22 }
  0x3d   : > { %p1142_p1 = pnand %p1140_p0, %p1386_p12  ;;  %p1147_p5 = por %p1146_p4, %p1145_p3 }
  0x3f   : > { %p1143_p2 = pneg %p1142_p1 }
  0x41   : > { %p1148_p6 = pnand %p1147_p5, %p1143_p2 }
  0x43   : > { %1151 = shalt.err (!%p1148_p6)
}
  0x44   : > { %s1152_s1 = scalar_lea.vmem %s1427_s30, 1024  ;;  %s1270_s24 = smov [#allocation2]  }
  0x45   : > { %p1153_p11 = scmp.ne.s32.totalorder %s1427_s30, %s1152_s1  ;;  %s1157_s18 = sshll.u32 %s1270_s24, 4  ;;  %s1158_s18 = int_to_ptr.vmem [resolvable:$false] %s1157_s18 }
  0x46   : > { %s1159_s17 = scalar_lea.vmem %s1158_s18, 2048  ;;  %p1160_p7 = scmp.lt.s32.totalorder %s1427_s30, %s1158_s18 }
  0x47   : > { %p1155_p13 = pnand %p1153_p11, %p1386_p12  ;;  %p1161_p0 = scmp.lt.s32.totalorder %s1159_s17, %s1152_s1 }
  0x49   : > { %p1156_p9 = pneg %p1155_p13  ;;  %p1162_p1 = por %p1161_p0, %p1160_p7 }
  0x4b   : > { %p1163_p10 = pnand %p1162_p1, %p1156_p9 }
  0x4d   : > { %1166 = shalt.err (!%p1163_p10)
}
  0x4e   : > { %s1853_s26 = smov 8   ;;  %s1854_s9 = smov 128  }
  0x4f   : > { %1064 = dma.hbm_to_vmem [thread:$0]  (!%p1364_p8), %s1424_s19, 1024, %s1427_s30, %s254_s20, %s1854_s9, %s1854_s9, %s1853_s26  }
  0x50   : > { %s301_s22 = scalar_lea.vmem [#allocation6], %s1359_s12  ;;  %s1167_s15 = scalar_lea.hbm %s1433_s27, 1024 }
  0x51   : > { %s309_s8 = sshll.u32 %s301_s22, 4  ;;  %p1168_p2 = scmp.ne.s32.totalorder %s1433_s27, %s1167_s15  ;;  %s310_s8 = int_to_ptr.vmem [resolvable:$true] %s309_s8 }
  0x52   : > { %s1172_s18 = scalar_lea.hbm %s1829_s2, 2048  ;;  %p1173_p4 = scmp.lt.s32.totalorder %s1433_s27, %s1829_s2 }
  0x53   : > { %p1170_p10 = pnand %p1168_p2, %p1386_p12  ;;  %p1174_p5 = scmp.lt.s32.totalorder %s1172_s18, %s1167_s15 }
  0x55   : > { %p1171_p3 = pneg %p1170_p10  ;;  %p1175_p6 = por %p1174_p5, %p1173_p4 }
  0x57   : > { %p1176_p11 = pnand %p1175_p6, %p1171_p3 }
  0x59   : > { %1179 = shalt.err (!%p1176_p11)
}
  0x5a   : > { %s1180_s19 = scalar_lea.vmem %s310_s8, 1024  ;;  %s1271_s30 = smov [#allocation6]  }
  0x5b   : > { %p1181_p13 = scmp.ne.s32.totalorder %s310_s8, %s1180_s19  ;;  %s1185_s20 = sshll.u32 %s1271_s30, 4  ;;  %s1186_s20 = int_to_ptr.vmem [resolvable:$false] %s1185_s20 }
  0x5c   : > { %s1187_s22 = scalar_lea.vmem %s1186_s20, 2048  ;;  %p1188_p0 = scmp.lt.s32.totalorder %s310_s8, %s1186_s20 }
  0x5d   : > { %p1183_p9 = pnand %p1181_p13, %p1386_p12  ;;  %p1189_p1 = scmp.lt.s32.totalorder %s1187_s22, %s1180_s19 }
  0x5f   : > { %p1184_p7 = pneg %p1183_p9  ;;  %p1190_p2 = por %p1189_p1, %p1188_p0 }
  0x61   : > { %p1191_p10 = pnand %p1190_p2, %p1184_p7 }
  0x63   : > { %1194 = shalt.err (!%p1191_p10)
}
  0x64   : > { %1070 = dma.hbm_to_vmem [thread:$0]  (!%p1364_p8), %s1433_s27, 1024, %s310_s8, %s1380_s21, %s1854_s9, %s1854_s9, %s1853_s26  }
  0x65   : > { %s1484_s1 = scalar_lea.hbm %s1830_s3, %s1362_s13  ;;  %s323_s24 = scalar_lea.vmem [#allocation7], %s1359_s12 }
  0x66   : > { %s331_s18 = sshll.u32 %s323_s24, 4  ;;  %s320_s17 = scalar_lea.sflag [#allocation8], %s1356_s11  ;;  %s1487_s18 = int_to_ptr.vmem [resolvable:$true] %s331_s18 }
  0x67   : > { %s1195_s19 = scalar_lea.hbm %s1484_s1, 1024  ;;  %s1200_s27 = scalar_lea.hbm %s1830_s3, 2048 }
  0x68   : > { %p1196_p3 = scmp.ne.s32.totalorder %s1484_s1, %s1195_s19  ;;  %p1201_p6 = scmp.lt.s32.totalorder %s1484_s1, %s1830_s3 }
  0x69   : > { %p1202_p11 = scmp.lt.s32.totalorder %s1200_s27, %s1195_s19 }
  0x6a   : > { %p1198_p4 = pnand %p1196_p3, %p1386_p12 }
  0x6b   : > { %p1203_p13 = por %p1202_p11, %p1201_p6 }
  0x6c   : > { %p1199_p5 = pneg %p1198_p4 }
  0x6e   : > { %p1204_p9 = pnand %p1203_p13, %p1199_p5 }
  0x70   : > { %1207 = shalt.err (!%p1204_p9)
}
  0x71   : > { %s1208_s11 = scalar_lea.vmem %s1487_s18, 1024  ;;  %s1272_s12 = smov [#allocation7]  }
  0x72   : > { %p1209_p7 = scmp.ne.s32.totalorder %s1487_s18, %s1208_s11  ;;  %s1213_s20 = sshll.u32 %s1272_s12, 4  ;;  %s1214_s20 = int_to_ptr.vmem [resolvable:$false] %s1213_s20 }
  0x73   : > { %s1215_s22 = scalar_lea.vmem %s1214_s20, 2048  ;;  %p1216_p2 = scmp.lt.s32.totalorder %s1487_s18, %s1214_s20 }
  0x74   : > { %p1211_p0 = pnand %p1209_p7, %p1386_p12  ;;  %p1217_p10 = scmp.lt.s32.totalorder %s1215_s22, %s1208_s11 }
  0x76   : > { %p1212_p1 = pneg %p1211_p0  ;;  %p1218_p3 = por %p1217_p10, %p1216_p2 }
  0x78   : > { %p1219_p4 = pnand %p1218_p3, %p1212_p1 }
  0x7a   : > { %1222 = shalt.err (!%p1219_p4)
}
  0x7b   : > { %1073 = dma.hbm_to_vmem [thread:$0]  (!%p1364_p8), %s1484_s1, 1024, %s1487_s18, %s320_s17, %s1854_s9, %s1854_s9, %s1853_s26  }
  0x7c   : > { %p1855_p12 = scmp.ne.s32.totalorder %s1851_s16, 0 }
  0x7d   : > { %s345_s23 = sand.u32 (!%p1855_p12), 1, %s1257_s25   ;;  %p1856_p5 = scmp.ne.s32.totalorder (!%p1855_p12), %s1845_s10, 0 }
  0x7e   : > { %343 = sbr.rel (%p1855_p12) target bundleno = 318 (0x13e), region = 36  ;;  %s1030_s0 = sshll.u32 (!%p1855_p12), %s345_s23, 6 }
  0x7f   : > { %s346_s15 = scalar_lea.sflag (!%p1855_p12), [#allocation3], %s345_s23  ;;  %s1516_s24 = scalar_lea.vmem (!%p1855_p12), [#allocation2], %s1030_s0 }
  0x83   : > { %1240 = dma.done.wait (%p1856_p5), %s346_s15, 1024  }
  0x84   : > { %1242 = vsyncadd (%p1856_p5), %s346_s15, 4294966272  ;;  %s354_s14 = sand.u32 1, %s1334_s28   ;;  %s1523_s26 = scalar_lea.vmem [#allocation4], %s1030_s0 }
  0x85   : > { %s355_s19 = scalar_lea.sflag [#allocation5], %s354_s14 }
  0x86   : > { %1244 = dma.done.wait (%p1856_p5), %s355_s19, 2048  }
  0x87   : > { %1246 = vsyncadd (%p1856_p5), %s355_s19, 4294965248  ;;  %s1529_s16 = scalar_lea.vmem [#allocation6], %s1030_s0  ;;  %s373_s9 = scalar_lea.sflag [#allocation8], %s345_s23 }
  0x88   : > { %s1531_s1 = scalar_lea.vmem [#allocation7], %s1030_s0 }
  0x89   : > { %1248 = dma.done.wait (%p1856_p5), %s373_s9, 1024  }
  0x8a   : > { %1250 = vsyncadd (%p1856_p5), %s373_s9, 4294966272  ;;  %s1034_s18 = sshll.u32 %s1334_s28, 2  ;;  %vm540_vm0 = vcmask 149504   ;;  %vm545_vm1 = vcmask 150528   ;;  %v550_v0 = vld [vmem:[%s1523_s26] sm:$0xff]  ;;  %s1273_s13 = smov 1  }
  0x8b   : > { %p446_p8 = scmp.lt.s32.totalorder %s1034_s18, 7  ;;  %v473_v1 = vld [vmem:[%s1516_s24] sm:$0xff]  ;;  %566 = vrot.lane.b32.xlu1 %v550_v0, %s1273_s13  ;;  %v1274_v2 = vmov 0.0   ;;  %v551_v3 = vld [vmem:[%s1523_s26 + $0x8] sm:$0xff]  ;;  %v476_v9 = vld [vmem:[%s1516_s24 + $0x18] sm:$0xff]  ;;  %vm513_vm2 = vcmask 7168  }
  0x8c   : > { %489 = vrot.lane.b32.xlu0 %v473_v1, %s1273_s13  ;;  %v474_v4 = vld [vmem:[%s1516_s24 + $0x8] sm:$0xff]  ;;  %v622_v6 = vld [vmem:[%s1529_s16] sm:$0xff]  ;;  %v475_v10 = vld [vmem:[%s1516_s24 + $0x10] sm:$0xff]  ;;  %vm522_vm3 = vcmask 138240   ;;  %vm531_vm4 = vcmask 154624  }
  0x8d   : > { %s1863_s18 = smov (!%p446_p8, %s1034_s18), 7  ;;  %v623_v5 = vld [vmem:[%s1529_s16 + $0x8] sm:$0xff]  ;;  %v694_v8 = vld [vmem:[%s1531_s1] sm:$0xff]  ;;  %v553_v11 = vld [vmem:[%s1523_s26 + $0x18] sm:$0xff] }
  0x8e   : > { %s1052_s17 = smul.u32 24, %s1863_s18  ;;  %v695_v7 = vld [vmem:[%s1531_s1 + $0x8] sm:$0xff]  ;;  %v552_v12 = vld [vmem:[%s1523_s26 + $0x10] sm:$0xff]  ;;  %v625_v13 = vld [vmem:[%s1529_s16 + $0x18] sm:$0xff] }
  0x8f   : > { %568 = vrot.lane.b32.xlu1 %v551_v3, %s1273_s13  ;;  %v624_v14 = vld [vmem:[%s1529_s16 + $0x10] sm:$0xff]  ;;  %v697_v15 = vld [vmem:[%s1531_s1 + $0x18] sm:$0xff]  ;;  %v478_v17 = vld [vmem:[%s1516_s24 + $0x28] sm:$0xff] }
  0x90   : > { %s1543_s27 = scalar_lea.vmem %s1832_s5, %s1052_s17  ;;  %s1548_s28 = scalar_lea.vmem %s1831_s4, %s1052_s17  ;;  %491 = vrot.lane.b32.xlu0 %v474_v4, %s1273_s13  ;;  %v696_v16 = vld [vmem:[%s1531_s1 + $0x10] sm:$0xff]  ;;  %v477_v18 = vld [vmem:[%s1516_s24 + $0x20] sm:$0xff]  ;;  %v555_v19 = vld [vmem:[%s1523_s26 + $0x28] sm:$0xff] }
  0x91   : > { %614 = vst.msk [vmem:[%s1543_s27] sm:$0x7] %vm540_vm0, %v1274_v2  ;;  %541 = vst.msk [vmem:[%s1548_s28] sm:$0x7] %vm540_vm0, %v1274_v2  ;;  %s1563_s20 = scalar_lea.vmem %s1833_s6, %s1052_s17  ;;  %s1568_s0 = scalar_lea.vmem %s1834_s7, %s1052_s17  ;;  %v554_v20 = vld [vmem:[%s1523_s26 + $0x20] sm:$0xff]  ;;  %v627_v21 = vld [vmem:[%s1529_s16 + $0x28] sm:$0xff] }
  0x92   : > { %618 = vst.msk [vmem:[%s1543_s27 + $0x13] sm:$0xf] %vm545_vm1, %v1274_v2  ;;  %546 = vst.msk [vmem:[%s1548_s28 + $0x13] sm:$0xf] %vm545_vm1, %v1274_v2  ;;  %v626_v22 = vld [vmem:[%s1529_s16 + $0x20] sm:$0xff]  ;;  %v699_v23 = vld [vmem:[%s1531_s1 + $0x28] sm:$0xff] }
  0x93   : > { %615 = vst.msk [vmem:[%s1543_s27 + $0x18] sm:$0x7] %vm540_vm0, %v1274_v2  ;;  %542 = vst.msk [vmem:[%s1548_s28 + $0x18] sm:$0x7] %vm540_vm0, %v1274_v2  ;;  %640 = vrot.lane.b32.xlu1 %v623_v5, %s1273_s13  ;;  %v698_v24 = vld [vmem:[%s1531_s1 + $0x20] sm:$0xff] }
  0x94   : > { %619 = vst.msk [vmem:[%s1543_s27 + $0x2b] sm:$0xf] %vm545_vm1, %v1274_v2  ;;  %547 = vst.msk [vmem:[%s1548_s28 + $0x2b] sm:$0xf] %vm545_vm1, %v1274_v2  ;;  %638 = vrot.lane.b32.xlu0 %v622_v6, %s1273_s13  ;;  %v480_v25 = vld [vmem:[%s1516_s24 + $0x38] sm:$0xff] }
  0x95   : > { %686 = vst.msk [vmem:[%s1563_s20] sm:$0x7] %vm540_vm0, %v1274_v2  ;;  %758 = vst.msk [vmem:[%s1568_s0] sm:$0x7] %vm540_vm0, %v1274_v2  ;;  %v479_v26 = vld [vmem:[%s1516_s24 + $0x30] sm:$0xff]  ;;  %v557_v27 = vld [vmem:[%s1523_s26 + $0x38] sm:$0xff] }
  0x96   : > { %690 = vst.msk [vmem:[%s1563_s20 + $0x13] sm:$0xf] %vm545_vm1, %v1274_v2  ;;  %762 = vst.msk [vmem:[%s1568_s0 + $0x13] sm:$0xf] %vm545_vm1, %v1274_v2  ;;  %v556_v28 = vld [vmem:[%s1523_s26 + $0x30] sm:$0xff]  ;;  %v629_v29 = vld [vmem:[%s1529_s16 + $0x38] sm:$0xff] }
  0x97   : > { %616 = vst.msk [vmem:[%s1543_s27 + $0x30] sm:$0x7] %vm540_vm0, %v1274_v2  ;;  %543 = vst.msk [vmem:[%s1548_s28 + $0x30] sm:$0x7] %vm540_vm0, %v1274_v2  ;;  %712 = vrot.lane.b32.xlu1 %v695_v7, %s1273_s13  ;;  %v628_v30 = vld [vmem:[%s1529_s16 + $0x30] sm:$0xff] }
  0x98   : > { %620 = vst.msk [vmem:[%s1543_s27 + $0x43] sm:$0xf] %vm545_vm1, %v1274_v2  ;;  %548 = vst.msk [vmem:[%s1548_s28 + $0x43] sm:$0xf] %vm545_vm1, %v1274_v2  ;;  %710 = vrot.lane.b32.xlu0 %v694_v8, %s1273_s13  ;;  %v701_v31 = vld [vmem:[%s1531_s1 + $0x38] sm:$0xff] }
  0x99   : > { %687 = vst.msk [vmem:[%s1563_s20 + $0x18] sm:$0x7] %vm540_vm0, %v1274_v2  ;;  %759 = vst.msk [vmem:[%s1568_s0 + $0x18] sm:$0x7] %vm540_vm0, %v1274_v2  ;;  %v700_v32 = vld [vmem:[%s1531_s1 + $0x30] sm:$0xff] }
  0x9a   : > { %691 = vst.msk [vmem:[%s1563_s20 + $0x2b] sm:$0xf] %vm545_vm1, %v1274_v2  ;;  %763 = vst.msk [vmem:[%s1568_s0 + $0x2b] sm:$0xf] %vm545_vm1, %v1274_v2 }
  0x9b   : > { %617 = vst.msk [vmem:[%s1543_s27 + $0x48] sm:$0x7] %vm540_vm0, %v1274_v2  ;;  %544 = vst.msk [vmem:[%s1548_s28 + $0x48] sm:$0x7] %vm540_vm0, %v1274_v2  ;;  %495 = vrot.lane.b32.xlu1 %v476_v9, %s1273_s13 }
  0x9c   : > { %621 = vst.msk [vmem:[%s1543_s27 + $0x5b] sm:$0xf] %vm545_vm1, %v1274_v2  ;;  %549 = vst.msk [vmem:[%s1548_s28 + $0x5b] sm:$0xf] %vm545_vm1, %v1274_v2  ;;  %493 = vrot.lane.b32.xlu0 %v475_v10, %s1273_s13 }
  0x9d   : > { %688 = vst.msk [vmem:[%s1563_s20 + $0x30] sm:$0x7] %vm540_vm0, %v1274_v2  ;;  %760 = vst.msk [vmem:[%s1568_s0 + $0x30] sm:$0x7] %vm540_vm0, %v1274_v2 }
  0x9e   : > { %692 = vst.msk [vmem:[%s1563_s20 + $0x43] sm:$0xf] %vm545_vm1, %v1274_v2  ;;  %764 = vst.msk [vmem:[%s1568_s0 + $0x43] sm:$0xf] %vm545_vm1, %v1274_v2 }
  0x9f   : > { %689 = vst.msk [vmem:[%s1563_s20 + $0x48] sm:$0x7] %vm540_vm0, %v1274_v2  ;;  %761 = vst.msk [vmem:[%s1568_s0 + $0x48] sm:$0x7] %vm540_vm0, %v1274_v2  ;;  %572 = vrot.lane.b32.xlu1 %v553_v11, %s1273_s13 }
  0xa0   : > { %693 = vst.msk [vmem:[%s1563_s20 + $0x5b] sm:$0xf] %vm545_vm1, %v1274_v2  ;;  %765 = vst.msk [vmem:[%s1568_s0 + $0x5b] sm:$0xf] %vm545_vm1, %v1274_v2  ;;  %570 = vrot.lane.b32.xlu0 %v552_v12, %s1273_s13 }
  0xa3   : > { %644 = vrot.lane.b32.xlu1 %v625_v13, %s1273_s13 }
  0xa4   : > { %642 = vrot.lane.b32.xlu0 %v624_v14, %s1273_s13 }
  0xa7   : > { %716 = vrot.lane.b32.xlu1 %v697_v15, %s1273_s13 }
  0xa8   : > { %714 = vrot.lane.b32.xlu0 %v696_v16, %s1273_s13 }
  0xab   : > { %499 = vrot.lane.b32.xlu1 %v478_v17, %s1273_s13 }
  0xac   : > { %497 = vrot.lane.b32.xlu0 %v477_v18, %s1273_s13 }
  0xaf   : > { %576 = vrot.lane.b32.xlu1 %v555_v19, %s1273_s13 }
  0xb0   : > { %574 = vrot.lane.b32.xlu0 %v554_v20, %s1273_s13 }
  0xb3   : > { %648 = vrot.lane.b32.xlu1 %v627_v21, %s1273_s13 }
  0xb4   : > { %646 = vrot.lane.b32.xlu0 %v626_v22, %s1273_s13 }
  0xb7   : > { %720 = vrot.lane.b32.xlu1 %v699_v23, %s1273_s13 }
  0xb8   : > { %718 = vrot.lane.b32.xlu0 %v698_v24, %s1273_s13 }
  0xbb   : > { %503 = vrot.lane.b32.xlu1 %v480_v25, %s1273_s13 }
  0xbc   : > { %501 = vrot.lane.b32.xlu0 %v479_v26, %s1273_s13 }
  0xbf   : > { %580 = vrot.lane.b32.xlu1 %v557_v27, %s1273_s13 }
  0xc0   : > { %578 = vrot.lane.b32.xlu0 %v556_v28, %s1273_s13 }
  0xc3   : > { %652 = vrot.lane.b32.xlu1 %v629_v29, %s1273_s13 }
  0xc4   : > { %650 = vrot.lane.b32.xlu0 %v628_v30, %s1273_s13 }
  0xc7   : > { %724 = vrot.lane.b32.xlu1 %v701_v31, %s1273_s13 }
  0xc8   : > { %722 = vrot.lane.b32.xlu0 %v700_v32, %s1273_s13 }
  0xfd   : > { %v567_v33 = vpop.permute.xlu1 %566 }
  0xfe   : > { %v490_v34 = vpop.permute.xlu0 %489  ;;  %v590_v35 = vsel %vm513_vm2, 0.0, %v567_v33 }
  0xff   : > { %v514_v36 = vsel %vm513_vm2, 0.0, %v490_v34  ;;  %v598_v37 = vsel %vm522_vm3, %v590_v35, 0.0 }
 0x100   : > { %v523_v38 = vsel %vm522_vm3, %v514_v36, 0.0  ;;  %606 = vst.msk [vmem:[%s1543_s27 + $0x3] sm:$0xff] %vm531_vm4, %v598_v37 }
 0x101   : > { %532 = vst.msk [vmem:[%s1548_s28 + $0x3] sm:$0xff] %vm531_vm4, %v523_v38  ;;  %v569_v39 = vpop.permute.xlu1 %568 }
 0x102   : > { %v492_v40 = vpop.permute.xlu0 %491  ;;  %v591_v41 = vsel %vm513_vm2, 0.0, %v569_v39 }
 0x103   : > { %v515_v42 = vsel %vm513_vm2, 0.0, %v492_v40  ;;  %v599_v43 = vsel %vm522_vm3, %v591_v41, 0.0 }
 0x104   : > { %v524_v44 = vsel %vm522_vm3, %v515_v42, 0.0  ;;  %607 = vst.msk [vmem:[%s1543_s27 + $0xb] sm:$0xff] %vm531_vm4, %v599_v43 }
 0x105   : > { %533 = vst.msk [vmem:[%s1548_s28 + $0xb] sm:$0xff] %vm531_vm4, %v524_v44  ;;  %v641_v45 = vpop.permute.xlu1 %640 }
 0x106   : > { %v639_v46 = vpop.permute.xlu0 %638  ;;  %v663_v47 = vsel %vm513_vm2, 0.0, %v641_v45 }
 0x107   : > { %v662_v48 = vsel %vm513_vm2, 0.0, %v639_v46  ;;  %v671_v49 = vsel %vm522_vm3, %v663_v47, 0.0 }
 0x108   : > { %v670_v50 = vsel %vm522_vm3, %v662_v48, 0.0  ;;  %679 = vst.msk [vmem:[%s1563_s20 + $0xb] sm:$0xff] %vm531_vm4, %v671_v49 }
 0x109   : > { %678 = vst.msk [vmem:[%s1563_s20 + $0x3] sm:$0xff] %vm531_vm4, %v670_v50  ;;  %v713_v51 = vpop.permute.xlu1 %712 }
 0x10a   : > { %v711_v52 = vpop.permute.xlu0 %710  ;;  %v735_v53 = vsel %vm513_vm2, 0.0, %v713_v51 }
 0x10b   : > { %v734_v54 = vsel %vm513_vm2, 0.0, %v711_v52  ;;  %v743_v55 = vsel %vm522_vm3, %v735_v53, 0.0 }
 0x10c   : > { %v742_v56 = vsel %vm522_vm3, %v734_v54, 0.0  ;;  %751 = vst.msk [vmem:[%s1568_s0 + $0xb] sm:$0xff] %vm531_vm4, %v743_v55 }
 0x10d   : > { %750 = vst.msk [vmem:[%s1568_s0 + $0x3] sm:$0xff] %vm531_vm4, %v742_v56  ;;  %v496_v57 = vpop.permute.xlu1 %495 }
 0x10e   : > { %v494_v58 = vpop.permute.xlu0 %493  ;;  %v517_v59 = vsel %vm513_vm2, 0.0, %v496_v57 }
 0x10f   : > { %v516_v60 = vsel %vm513_vm2, 0.0, %v494_v58  ;;  %v526_v61 = vsel %vm522_vm3, %v517_v59, 0.0 }
 0x110   : > { %v525_v62 = vsel %vm522_vm3, %v516_v60, 0.0  ;;  %535 = vst.msk [vmem:[%s1548_s28 + $0x23] sm:$0xff] %vm531_vm4, %v526_v61 }
 0x111   : > { %534 = vst.msk [vmem:[%s1548_s28 + $0x1b] sm:$0xff] %vm531_vm4, %v525_v62  ;;  %v573_v63 = vpop.permute.xlu1 %572 }
 0x112   : > { %v571_v0 = vpop.permute.xlu0 %570  ;;  %v593_v1 = vsel %vm513_vm2, 0.0, %v573_v63 }
 0x113   : > { %v592_v2 = vsel %vm513_vm2, 0.0, %v571_v0  ;;  %v601_v3 = vsel %vm522_vm3, %v593_v1, 0.0 }
 0x114   : > { %v600_v4 = vsel %vm522_vm3, %v592_v2, 0.0  ;;  %609 = vst.msk [vmem:[%s1543_s27 + $0x23] sm:$0xff] %vm531_vm4, %v601_v3 }
 0x115   : > { %608 = vst.msk [vmem:[%s1543_s27 + $0x1b] sm:$0xff] %vm531_vm4, %v600_v4  ;;  %v645_v5 = vpop.permute.xlu1 %644 }
 0x116   : > { %v643_v6 = vpop.permute.xlu0 %642  ;;  %v665_v7 = vsel %vm513_vm2, 0.0, %v645_v5 }
 0x117   : > { %v664_v8 = vsel %vm513_vm2, 0.0, %v643_v6  ;;  %v673_v9 = vsel %vm522_vm3, %v665_v7, 0.0 }
 0x118   : > { %v672_v10 = vsel %vm522_vm3, %v664_v8, 0.0  ;;  %681 = vst.msk [vmem:[%s1563_s20 + $0x23] sm:$0xff] %vm531_vm4, %v673_v9 }
 0x119   : > { %680 = vst.msk [vmem:[%s1563_s20 + $0x1b] sm:$0xff] %vm531_vm4, %v672_v10  ;;  %v717_v11 = vpop.permute.xlu1 %716 }
 0x11a   : > { %v715_v12 = vpop.permute.xlu0 %714  ;;  %v737_v13 = vsel %vm513_vm2, 0.0, %v717_v11 }
 0x11b   : > { %v736_v14 = vsel %vm513_vm2, 0.0, %v715_v12  ;;  %v745_v15 = vsel %vm522_vm3, %v737_v13, 0.0 }
 0x11c   : > { %v744_v16 = vsel %vm522_vm3, %v736_v14, 0.0  ;;  %753 = vst.msk [vmem:[%s1568_s0 + $0x23] sm:$0xff] %vm531_vm4, %v745_v15 }
 0x11d   : > { %752 = vst.msk [vmem:[%s1568_s0 + $0x1b] sm:$0xff] %vm531_vm4, %v744_v16  ;;  %v500_v17 = vpop.permute.xlu1 %499 }
 0x11e   : > { %v498_v18 = vpop.permute.xlu0 %497  ;;  %v519_v19 = vsel %vm513_vm2, 0.0, %v500_v17 }
 0x11f   : > { %v518_v20 = vsel %vm513_vm2, 0.0, %v498_v18  ;;  %v528_v21 = vsel %vm522_vm3, %v519_v19, 0.0 }
 0x120   : > { %v527_v22 = vsel %vm522_vm3, %v518_v20, 0.0  ;;  %537 = vst.msk [vmem:[%s1548_s28 + $0x3b] sm:$0xff] %vm531_vm4, %v528_v21 }
 0x121   : > { %536 = vst.msk [vmem:[%s1548_s28 + $0x33] sm:$0xff] %vm531_vm4, %v527_v22  ;;  %v577_v23 = vpop.permute.xlu1 %576 }
 0x122   : > { %v575_v24 = vpop.permute.xlu0 %574  ;;  %v595_v25 = vsel %vm513_vm2, 0.0, %v577_v23 }
 0x123   : > { %v594_v26 = vsel %vm513_vm2, 0.0, %v575_v24  ;;  %v603_v27 = vsel %vm522_vm3, %v595_v25, 0.0 }
 0x124   : > { %v602_v28 = vsel %vm522_vm3, %v594_v26, 0.0  ;;  %611 = vst.msk [vmem:[%s1543_s27 + $0x3b] sm:$0xff] %vm531_vm4, %v603_v27 }
 0x125   : > { %610 = vst.msk [vmem:[%s1543_s27 + $0x33] sm:$0xff] %vm531_vm4, %v602_v28  ;;  %v649_v29 = vpop.permute.xlu1 %648 }
 0x126   : > { %v647_v30 = vpop.permute.xlu0 %646  ;;  %v667_v31 = vsel %vm513_vm2, 0.0, %v649_v29 }
 0x127   : > { %v666_v32 = vsel %vm513_vm2, 0.0, %v647_v30  ;;  %v675_v33 = vsel %vm522_vm3, %v667_v31, 0.0 }
 0x128   : > { %v674_v34 = vsel %vm522_vm3, %v666_v32, 0.0  ;;  %683 = vst.msk [vmem:[%s1563_s20 + $0x3b] sm:$0xff] %vm531_vm4, %v675_v33 }
 0x129   : > { %682 = vst.msk [vmem:[%s1563_s20 + $0x33] sm:$0xff] %vm531_vm4, %v674_v34  ;;  %v721_v35 = vpop.permute.xlu1 %720 }
 0x12a   : > { %v719_v36 = vpop.permute.xlu0 %718  ;;  %v739_v37 = vsel %vm513_vm2, 0.0, %v721_v35 }
 0x12b   : > { %v738_v38 = vsel %vm513_vm2, 0.0, %v719_v36  ;;  %v747_v39 = vsel %vm522_vm3, %v739_v37, 0.0 }
 0x12c   : > { %v746_v40 = vsel %vm522_vm3, %v738_v38, 0.0  ;;  %755 = vst.msk [vmem:[%s1568_s0 + $0x3b] sm:$0xff] %vm531_vm4, %v747_v39 }
 0x12d   : > { %754 = vst.msk [vmem:[%s1568_s0 + $0x33] sm:$0xff] %vm531_vm4, %v746_v40  ;;  %v504_v41 = vpop.permute.xlu1 %503 }
 0x12e   : > { %v502_v42 = vpop.permute.xlu0 %501  ;;  %v521_v43 = vsel %vm513_vm2, 0.0, %v504_v41 }
 0x12f   : > { %v520_v44 = vsel %vm513_vm2, 0.0, %v502_v42  ;;  %v530_v45 = vsel %vm522_vm3, %v521_v43, 0.0 }
 0x130   : > { %v529_v46 = vsel %vm522_vm3, %v520_v44, 0.0  ;;  %539 = vst.msk [vmem:[%s1548_s28 + $0x53] sm:$0xff] %vm531_vm4, %v530_v45 }
 0x131   : > { %538 = vst.msk [vmem:[%s1548_s28 + $0x4b] sm:$0xff] %vm531_vm4, %v529_v46  ;;  %v581_v47 = vpop.permute.xlu1 %580 }
 0x132   : > { %v579_v48 = vpop.permute.xlu0 %578  ;;  %v597_v49 = vsel %vm513_vm2, 0.0, %v581_v47 }
 0x133   : > { %v596_v50 = vsel %vm513_vm2, 0.0, %v579_v48  ;;  %v605_v51 = vsel %vm522_vm3, %v597_v49, 0.0 }
 0x134   : > { %v604_v52 = vsel %vm522_vm3, %v596_v50, 0.0  ;;  %613 = vst.msk [vmem:[%s1543_s27 + $0x53] sm:$0xff] %vm531_vm4, %v605_v51 }
 0x135   : > { %612 = vst.msk [vmem:[%s1543_s27 + $0x4b] sm:$0xff] %vm531_vm4, %v604_v52  ;;  %v653_v53 = vpop.permute.xlu1 %652 }
 0x136   : > { %v651_v54 = vpop.permute.xlu0 %650  ;;  %v669_v55 = vsel %vm513_vm2, 0.0, %v653_v53 }
 0x137   : > { %v668_v56 = vsel %vm513_vm2, 0.0, %v651_v54  ;;  %v677_v57 = vsel %vm522_vm3, %v669_v55, 0.0 }
 0x138   : > { %v676_v58 = vsel %vm522_vm3, %v668_v56, 0.0  ;;  %685 = vst.msk [vmem:[%s1563_s20 + $0x53] sm:$0xff] %vm531_vm4, %v677_v57 }
 0x139   : > { %684 = vst.msk [vmem:[%s1563_s20 + $0x4b] sm:$0xff] %vm531_vm4, %v676_v58  ;;  %v725_v59 = vpop.permute.xlu1 %724 }
 0x13a   : > { %v723_v60 = vpop.permute.xlu0 %722  ;;  %v741_v61 = vsel %vm513_vm2, 0.0, %v725_v59 }
 0x13b   : > { %v740_v62 = vsel %vm513_vm2, 0.0, %v723_v60  ;;  %v749_v63 = vsel %vm522_vm3, %v741_v61, 0.0 }
 0x13c   : > { %v748_v0 = vsel %vm522_vm3, %v740_v62, 0.0  ;;  %757 = vst.msk [vmem:[%s1568_s0 + $0x53] sm:$0xff] %vm531_vm4, %v749_v63 }
 0x13d   : > { %756 = vst.msk [vmem:[%s1568_s0 + $0x4b] sm:$0xff] %vm531_vm4, %v748_v0 }
 0x13e PF: > { %s1857_s15 = sld [smem:[#allocation12_spill]]  ;;  %p24_p6 = scmp.ge.s32.totalorder %s1337_s29, 4  }
 0x13f   : > { %s1858_s26 = sld [smem:[#allocation13_spill]]  ;;  %s1859_s24 = smov %s1257_s25 }
 0x140   : > { %s1861_s27 = smov %s1337_s29  ;;  %26 = sbr.rel (!%p24_p6) target bundleno = 10 (0xa), region = 149 }
 0x144   : > { %s1860_s25 = smov %s1857_s15 }
 0x145   :  { %847 = vsyncpa [#allocation3], 1 }
 0x146   :  { %849 = vsyncpa [#allocation3 + $0x1], 1 }
 0x147   :  { %850 = vsyncpa [#allocation5], 1 }
 0x148   :  { %852 = vsyncpa [#allocation5 + $0x1], 1 }
 0x149   :  { %853 = vsyncpa [#allocation8], 1 }
 0x14a   :  { %855 = vsyncpa [#allocation8 + $0x1], 1 }

</bundles_post_ra>
